<compile_context>
chip_gen: v6e
topology: v6e:2x2x1
jax: 0.10.0
libtpu: 0.0.40
codegen_flags: <defaults>
</compile_context>

<pallas_src>
import functools

import jax
import jax.numpy as jnp
from jax.experimental import pallas as pl
from jax.experimental.pallas import tpu as pltpu

# ---------------- model hyper-parameters (small, consistent with the module) --
INPUT_DIM = 32
HIDDEN_DIMS = [64, 32]
LATENT_DIM = 16
BATCH = 8

# (out, in) per fused layer, torch weight layout / feature-major activations.
LAYER_DIMS = (
    (HIDDEN_DIMS[0], INPUT_DIM),        # enc Linear(32, 64)
    (HIDDEN_DIMS[1], HIDDEN_DIMS[0]),   # enc Linear(64, 32)
    (2 * LATENT_DIM, HIDDEN_DIMS[1]),   # fused [mu ; logvar] head  (32, 32)
    (HIDDEN_DIMS[1], LATENT_DIM),       # dec Linear(16, 32)
    (HIDDEN_DIMS[0], HIDDEN_DIMS[1]),   # dec Linear(32, 64)
    (INPUT_DIM, HIDDEN_DIMS[0]),        # dec Linear(64, 32)
)
N_LAYERS = len(LAYER_DIMS)
MAXD = 64                               # padded side of each packed weight slab


# ------------------------------ kernel ---------------------------------------
def vae_forward_kernel(x_ref, eps_ref, w_ref, b_ref, xrec_ref, mu_ref, lv_ref):
    f32 = jnp.float32

    def linear(k, a):
        out_d, in_d = LAYER_DIMS[k]
        w = w_ref[k, :out_d, :in_d]                 # [out, in]  (bf16 operand)
        b = b_ref[k, :out_d, :]                     # [out, 1]   (f32)
        y = jnp.dot(w, a.astype(w.dtype), preferred_element_type=f32)
        return y + b                                # bias add in f32

    x = x_ref[...]                                  # [32, T] f32 (batch on lanes)

    # ----- shared encoder -----
    h = jnp.maximum(linear(0, x), 0.0)              # Linear(32,64) + ReLU
    # TODO(synk): nn.Dropout is eval-mode identity here; training-mode dropout
    # would need pltpu.prng_* masks inside the kernel.
    h = jnp.maximum(linear(1, h), 0.0)              # Linear(64,32) + ReLU

    # ----- fused latent heads: rows 0..15 = mu, rows 16..31 = logvar -----
    head = linear(2, h)                             # [32, T]
    mu = head[:LATENT_DIM, :]
    lv = head[LATENT_DIM:2 * LATENT_DIM, :]

    # ----- reparameterize: z = mu + eps * exp(logvar / 2) -----
    z = mu + eps_ref[...] * jnp.exp(lv * 0.5)       # [16, T]

    # ----- decoder -----
    d = jnp.maximum(linear(3, z), 0.0)              # Linear(16,32) + ReLU
    d = jnp.maximum(linear(4, d), 0.0)              # Linear(32,64) + ReLU
    logits = linear(5, d)                           # Linear(64,32)

    xrec_ref[...] = jax.nn.sigmoid(logits)
    mu_ref[...] = mu
    lv_ref[...] = lv


# ------------------------------ wrapper --------------------------------------
@functools.partial(jax.jit, static_argnames=("tile_b",))
def vae_forward(x, eps, w_blob, b_blob, *, tile_b=128):
    """x: [B, 32] (or [32]), eps: [B, 16]. Returns (x_rec, mu, logvar), batch-major."""
    if x.ndim == 1:                                 # mirror torch's x.unsqueeze(0)
        x = x[None, :]
        eps = eps[None, :]
    B = x.shape[0]
    n_tiles = pl.cdiv(B, tile_b)
    Bp = n_tiles * tile_b

    # Feature-major, zero-padded batch so every output block is 128-lane dense.
    xT = jnp.zeros((INPUT_DIM, Bp), jnp.float32).at[:, :B].set(
        x.T.astype(jnp.float32))
    epsT = jnp.zeros((LATENT_DIM, Bp), jnp.float32).at[:, :B].set(
        eps.T.astype(jnp.float32))

    flops_per_row = 2 * sum(o * i for o, i in LAYER_DIMS)
    cost = pl.CostEstimate(
        flops=flops_per_row * Bp,
        transcendentals=(LATENT_DIM + INPUT_DIM) * Bp,   # exp + sigmoid per row
        bytes_accessed=int(
            (2 * INPUT_DIM + 3 * LATENT_DIM) * Bp * 4
            + w_blob.size * w_blob.dtype.itemsize
            + b_blob.size * b_blob.dtype.itemsize),
    )

    grid_spec = pltpu.PrefetchScalarGridSpec(
        num_scalar_prefetch=0,
        grid=(n_tiles,),
        in_specs=[
            pl.BlockSpec((INPUT_DIM, tile_b), lambda i: (0, i)),      # x
            pl.BlockSpec((LATENT_DIM, tile_b), lambda i: (0, i)),     # eps
            pl.BlockSpec((N_LAYERS, MAXD, MAXD), lambda i: (0, 0, 0)),  # packed W
            pl.BlockSpec((N_LAYERS, MAXD, 1), lambda i: (0, 0, 0)),     # packed b
        ],
        out_specs=(
            pl.BlockSpec((INPUT_DIM, tile_b), lambda i: (0, i)),      # x_rec
            pl.BlockSpec((LATENT_DIM, tile_b), lambda i: (0, i)),     # mu
            pl.BlockSpec((LATENT_DIM, tile_b), lambda i: (0, i)),     # logvar
        ),
    )

    xrecT, muT, lvT = pl.pallas_call(
        vae_forward_kernel,
        out_shape=(
            jax.ShapeDtypeStruct((INPUT_DIM, Bp), jnp.float32),
            jax.ShapeDtypeStruct((LATENT_DIM, Bp), jnp.float32),
            jax.ShapeDtypeStruct((LATENT_DIM, Bp), jnp.float32),
        ),
        grid_spec=grid_spec,
        compiler_params=pltpu.CompilerParams(
            dimension_semantics=("parallel",)),
        cost_estimate=cost,
    )(xT, epsT, w_blob, b_blob)

    return xrecT[:, :B].T, muT[:, :B].T, lvT[:, :B].T


# ------------------------------ params ---------------------------------------
def init_params(key):
    """Deterministic torch-layout Linear params: W [out, in], b [out]."""
    dims = [
        ("e0", INPUT_DIM, HIDDEN_DIMS[0]),
        ("e1", HIDDEN_DIMS[0], HIDDEN_DIMS[1]),
        ("mu", HIDDEN_DIMS[-1], LATENT_DIM),
        ("lv", HIDDEN_DIMS[-1], LATENT_DIM),
        ("d0", LATENT_DIM, HIDDEN_DIMS[1]),
        ("d1", HIDDEN_DIMS[1], HIDDEN_DIMS[0]),
        ("d2", HIDDEN_DIMS[0], INPUT_DIM),
    ]
    params = {}
    for name, fan_in, fan_out in dims:
        key, kw, kb = jax.random.split(key, 3)
        bound = 1.0 / (fan_in ** 0.5)               # torch.nn.Linear init range
        w = jax.random.uniform(kw, (fan_out, fan_in), jnp.float32, -bound, bound)
        b = jax.random.uniform(kb, (fan_out,), jnp.float32, -bound, bound)
        params[name] = (w, b)
    return params


def pack_params(params, w_dtype=jnp.bfloat16):
    """Fuse mu|logvar and pack every layer into two padded blobs (2 DMAs total)."""
    w_mu, b_mu = params["mu"]
    w_lv, b_lv = params["lv"]
    layers = [
        params["e0"],
        params["e1"],
        (jnp.concatenate([w_mu, w_lv], axis=0),
         jnp.concatenate([b_mu, b_lv], axis=0)),
        params["d0"],
        params["d1"],
        params["d2"],
    ]
    w_blob = jnp.zeros((N_LAYERS, MAXD, MAXD), w_dtype)
    b_blob = jnp.zeros((N_LAYERS, MAXD, 1), jnp.float32)
    for k, (w, b) in enumerate(layers):
        o, i = w.shape
        assert (o, i) == LAYER_DIMS[k]
        w_blob = w_blob.at[k, :o, :i].set(w.astype(w_dtype))
        b_blob = b_blob.at[k, :o, 0].set(b.astype(jnp.float32))
    return w_blob, b_blob


# ------------------------------ pure-JAX reference ----------------------------
def vae_reference(x, eps, w_blob, b_blob):
    """Mirror of the kernel math (same bf16 operand rounding, f32 accumulation)."""
    if x.ndim == 1:
        x = x[None, :]
        eps = eps[None, :]
    a = x.T.astype(jnp.float32)

    def linear(k, a):
        o, i = LAYER_DIMS[k]
        w = w_blob[k, :o, :i]
        b = b_blob[k, :o, :]
        return jnp.dot(w, a.astype(w.dtype), preferred_element_type=jnp.float32) + b

    h = jnp.maximum(linear(0, a), 0.0)
    h = jnp.maximum(linear(1, h), 0.0)
    head = linear(2, h)
    mu = head[:LATENT_DIM]
    lv = head[LATENT_DIM:2 * LATENT_DIM]
    z = mu + eps.T.astype(jnp.float32) * jnp.exp(lv * 0.5)
    d = jnp.maximum(linear(3, z), 0.0)
    d = jnp.maximum(linear(4, d), 0.0)
    xr = jax.nn.sigmoid(linear(5, d))
    return xr.T, mu.T, lv.T


# ------------------------------ demo -----------------------------------------
if __name__ == "__main__":
    key = jax.random.PRNGKey(0)
    key, kx, keps, kp = jax.random.split(key, 4)

    params = init_params(kp)
    w_blob, b_blob = pack_params(params)

    x = jax.random.normal(kx, (BATCH, INPUT_DIM), jnp.float32)
    eps = jax.random.normal(keps, (BATCH, LATENT_DIM), jnp.float32)

    x_rec, mu, logvar = vae_forward(x, eps, w_blob, b_blob)
    jax.block_until_ready((x_rec, mu, logvar))

    assert x_rec.shape == (BATCH, INPUT_DIM)
    assert mu.shape == (BATCH, LATENT_DIM)
    assert logvar.shape == (BATCH, LATENT_DIM)
    assert bool(jnp.all(jnp.isfinite(x_rec)))
    assert bool(jnp.all((x_rec >= 0.0) & (x_rec <= 1.0)))   # sigmoid output range

    xr_ref, mu_ref, lv_ref = vae_reference(x, eps, w_blob, b_blob)
    assert bool(jnp.allclose(x_rec, xr_ref, atol=5e-3, rtol=5e-3))
    assert bool(jnp.allclose(mu, mu_ref, atol=5e-3, rtol=5e-3))
    assert bool(jnp.allclose(logvar, lv_ref, atol=5e-3, rtol=5e-3))

    # Second run with a ragged, multi-tile batch to exercise the parallel grid
    # and the batch-padding path.
    B2 = 300
    key, kx2, ke2 = jax.random.split(key, 3)
    x2 = jax.random.normal(kx2, (B2, INPUT_DIM), jnp.float32)
    eps2 = jax.random.normal(ke2, (B2, LATENT_DIM), jnp.float32)
    xr2, mu2, lv2 = vae_forward(x2, eps2, w_blob, b_blob, tile_b=128)
    jax.block_until_ready((xr2, mu2, lv2))
    xr2_ref, mu2_ref, lv2_ref = vae_reference(x2, eps2, w_blob, b_blob)
    assert bool(jnp.allclose(xr2, xr2_ref, atol=5e-3, rtol=5e-3))
    assert bool(jnp.allclose(mu2, mu2_ref, atol=5e-3, rtol=5e-3))
    assert bool(jnp.allclose(lv2, lv2_ref, atol=5e-3, rtol=5e-3))

    print("KERNEL_OK")
</pallas_src>

<mosaic_0001>
module attributes {stable_mosaic.version = 11 : i64} {
  func.func @vae_forward_kernel(%arg0: i32, %arg1: memref<32x128xf32, #tpu.memory_space<vmem>>, %arg2: memref<16x128xf32, #tpu.memory_space<vmem>>, %arg3: memref<6x64x64xbf16, #tpu.memory_space<vmem>>, %arg4: memref<6x64x1xf32, #tpu.memory_space<vmem>>, %arg5: memref<32x128xf32, #tpu.memory_space<vmem>>, %arg6: memref<16x128xf32, #tpu.memory_space<vmem>>, %arg7: memref<16x128xf32, #tpu.memory_space<vmem>>) attributes {dimension_semantics = [#tpu.dimension_semantics<parallel>], iteration_bounds = array<i64: 1>, scalar_prefetch = 0 : i64, scratch_operands = 0 : i64, tpu.core_type = #tpu.core_type<tc>, window_params = [{transform_indices = @transform_0, window_bounds = array<i64: 32, 128>}, {transform_indices = @transform_1, window_bounds = array<i64: 16, 128>}, {pipeline_mode = #tpu.pipeline_mode<synchronous>, transform_indices = @transform_2, window_bounds = array<i64: 6, 64, 64>}, {pipeline_mode = #tpu.pipeline_mode<synchronous>, transform_indices = @transform_3, window_bounds = array<i64: 6, 64, 1>}, {transform_indices = @transform_4, window_bounds = array<i64: 32, 128>}, {transform_indices = @transform_5, window_bounds = array<i64: 16, 128>}, {transform_indices = @transform_6, window_bounds = array<i64: 16, 128>}]} {
    %c0 = arith.constant 0 : index
    %c0_0 = arith.constant 0 : index
    %0 = vector.load %arg1[%c0, %c0_0] : memref<32x128xf32, #tpu.memory_space<vmem>>, vector<32x128xf32>
    %c0_1 = arith.constant 0 : index
    %c0_2 = arith.constant 0 : index
    %c0_3 = arith.constant 0 : index
    %1 = vector.load %arg3[%c0_1, %c0_2, %c0_3] : memref<6x64x64xbf16, #tpu.memory_space<vmem>>, vector<1x64x32xbf16>
    %2 = vector.shape_cast %1 : vector<1x64x32xbf16> to vector<64x32xbf16>
    %c0_4 = arith.constant 0 : index
    %c0_5 = arith.constant 0 : index
    %c0_6 = arith.constant 0 : index
    %3 = vector.load %arg4[%c0_4, %c0_5, %c0_6] : memref<6x64x1xf32, #tpu.memory_space<vmem>>, vector<1x64x1xf32>
    %4 = vector.shape_cast %3 : vector<1x64x1xf32> to vector<64x1xf32>
    %5 = arith.truncf %0 : vector<32x128xf32> to vector<32x128xbf16>
    %cst = arith.constant dense<0.000000e+00> : vector<64x128xf32>
    %6 = tpu.matmul %2, %5, %cst {dimension_numbers = #tpu.dot_dimension_numbers<[1], [0], [0], [1], [0, 0, 1, 1], [], []>} : vector<64x32xbf16>, vector<32x128xbf16>, vector<64x128xf32> -> vector<64x128xf32>
    %7 = vector.broadcast %4 : vector<64x1xf32> to vector<64x128xf32>
    %8 = arith.addf %6, %7 : vector<64x128xf32>
    %cst_7 = arith.constant 0.000000e+00 : f32
    %9 = vector.broadcast %cst_7 : f32 to vector<64x128xf32>
    %10 = arith.maximumf %8, %9 : vector<64x128xf32>
    %c1 = arith.constant 1 : index
    %c0_8 = arith.constant 0 : index
    %c0_9 = arith.constant 0 : index
    %11 = vector.load %arg3[%c1, %c0_8, %c0_9] : memref<6x64x64xbf16, #tpu.memory_space<vmem>>, vector<1x32x64xbf16>
    %12 = vector.shape_cast %11 : vector<1x32x64xbf16> to vector<32x64xbf16>
    %c1_10 = arith.constant 1 : index
    %c0_11 = arith.constant 0 : index
    %c0_12 = arith.constant 0 : index
    %13 = vector.load %arg4[%c1_10, %c0_11, %c0_12] : memref<6x64x1xf32, #tpu.memory_space<vmem>>, vector<1x32x1xf32>
    %14 = vector.shape_cast %13 : vector<1x32x1xf32> to vector<32x1xf32>
    %15 = arith.truncf %10 : vector<64x128xf32> to vector<64x128xbf16>
    %cst_13 = arith.constant dense<0.000000e+00> : vector<32x128xf32>
    %16 = tpu.matmul %12, %15, %cst_13 {dimension_numbers = #tpu.dot_dimension_numbers<[1], [0], [0], [1], [0, 0, 1, 1], [], []>} : vector<32x64xbf16>, vector<64x128xbf16>, vector<32x128xf32> -> vector<32x128xf32>
    %17 = vector.broadcast %14 : vector<32x1xf32> to vector<32x128xf32>
    %18 = arith.addf %16, %17 : vector<32x128xf32>
    %cst_14 = arith.constant 0.000000e+00 : f32
    %19 = vector.broadcast %cst_14 : f32 to vector<32x128xf32>
    %20 = arith.maximumf %18, %19 : vector<32x128xf32>
    %c2 = arith.constant 2 : index
    %c0_15 = arith.constant 0 : index
    %c0_16 = arith.constant 0 : index
    %21 = vector.load %arg3[%c2, %c0_15, %c0_16] : memref<6x64x64xbf16, #tpu.memory_space<vmem>>, vector<1x32x32xbf16>
    %22 = vector.shape_cast %21 : vector<1x32x32xbf16> to vector<32x32xbf16>
    %c2_17 = arith.constant 2 : index
    %c0_18 = arith.constant 0 : index
    %c0_19 = arith.constant 0 : index
    %23 = vector.load %arg4[%c2_17, %c0_18, %c0_19] : memref<6x64x1xf32, #tpu.memory_space<vmem>>, vector<1x32x1xf32>
    %24 = vector.shape_cast %23 : vector<1x32x1xf32> to vector<32x1xf32>
    %25 = arith.truncf %20 : vector<32x128xf32> to vector<32x128xbf16>
    %cst_20 = arith.constant dense<0.000000e+00> : vector<32x128xf32>
    %26 = tpu.matmul %22, %25, %cst_20 {dimension_numbers = #tpu.dot_dimension_numbers<[1], [0], [0], [1], [0, 0, 1, 1], [], []>} : vector<32x32xbf16>, vector<32x128xbf16>, vector<32x128xf32> -> vector<32x128xf32>
    %27 = vector.broadcast %24 : vector<32x1xf32> to vector<32x128xf32>
    %28 = arith.addf %26, %27 : vector<32x128xf32>
    %29 = vector.extract_strided_slice %28 {offsets = [0, 0], sizes = [16, 128], strides = [1, 1]} : vector<32x128xf32> to vector<16x128xf32>
    %30 = vector.extract_strided_slice %28 {offsets = [16, 0], sizes = [16, 128], strides = [1, 1]} : vector<32x128xf32> to vector<16x128xf32>
    %c0_21 = arith.constant 0 : index
    %c0_22 = arith.constant 0 : index
    %31 = vector.load %arg2[%c0_21, %c0_22] : memref<16x128xf32, #tpu.memory_space<vmem>>, vector<16x128xf32>
    %cst_23 = arith.constant 5.000000e-01 : f32
    %32 = vector.broadcast %cst_23 : f32 to vector<16x128xf32>
    %33 = arith.mulf %30, %32 : vector<16x128xf32>
    %34 = math.exp %33 : vector<16x128xf32>
    %35 = arith.mulf %31, %34 : vector<16x128xf32>
    %36 = arith.addf %29, %35 : vector<16x128xf32>
    %c3 = arith.constant 3 : index
    %c0_24 = arith.constant 0 : index
    %c0_25 = arith.constant 0 : index
    %37 = vector.load %arg3[%c3, %c0_24, %c0_25] : memref<6x64x64xbf16, #tpu.memory_space<vmem>>, vector<1x32x16xbf16>
    %38 = vector.shape_cast %37 : vector<1x32x16xbf16> to vector<32x16xbf16>
    %c3_26 = arith.constant 3 : index
    %c0_27 = arith.constant 0 : index
    %c0_28 = arith.constant 0 : index
    %39 = vector.load %arg4[%c3_26, %c0_27, %c0_28] : memref<6x64x1xf32, #tpu.memory_space<vmem>>, vector<1x32x1xf32>
    %40 = vector.shape_cast %39 : vector<1x32x1xf32> to vector<32x1xf32>
    %41 = arith.truncf %36 : vector<16x128xf32> to vector<16x128xbf16>
    %cst_29 = arith.constant dense<0.000000e+00> : vector<32x128xf32>
    %42 = tpu.matmul %38, %41, %cst_29 {dimension_numbers = #tpu.dot_dimension_numbers<[1], [0], [0], [1], [0, 0, 1, 1], [], []>} : vector<32x16xbf16>, vector<16x128xbf16>, vector<32x128xf32> -> vector<32x128xf32>
    %43 = vector.broadcast %40 : vector<32x1xf32> to vector<32x128xf32>
    %44 = arith.addf %42, %43 : vector<32x128xf32>
    %cst_30 = arith.constant 0.000000e+00 : f32
    %45 = vector.broadcast %cst_30 : f32 to vector<32x128xf32>
    %46 = arith.maximumf %44, %45 : vector<32x128xf32>
    %c4 = arith.constant 4 : index
    %c0_31 = arith.constant 0 : index
    %c0_32 = arith.constant 0 : index
    %47 = vector.load %arg3[%c4, %c0_31, %c0_32] : memref<6x64x64xbf16, #tpu.memory_space<vmem>>, vector<1x64x32xbf16>
    %48 = vector.shape_cast %47 : vector<1x64x32xbf16> to vector<64x32xbf16>
    %c4_33 = arith.constant 4 : index
    %c0_34 = arith.constant 0 : index
    %c0_35 = arith.constant 0 : index
    %49 = vector.load %arg4[%c4_33, %c0_34, %c0_35] : memref<6x64x1xf32, #tpu.memory_space<vmem>>, vector<1x64x1xf32>
    %50 = vector.shape_cast %49 : vector<1x64x1xf32> to vector<64x1xf32>
    %51 = arith.truncf %46 : vector<32x128xf32> to vector<32x128xbf16>
    %cst_36 = arith.constant dense<0.000000e+00> : vector<64x128xf32>
    %52 = tpu.matmul %48, %51, %cst_36 {dimension_numbers = #tpu.dot_dimension_numbers<[1], [0], [0], [1], [0, 0, 1, 1], [], []>} : vector<64x32xbf16>, vector<32x128xbf16>, vector<64x128xf32> -> vector<64x128xf32>
    %53 = vector.broadcast %50 : vector<64x1xf32> to vector<64x128xf32>
    %54 = arith.addf %52, %53 : vector<64x128xf32>
    %cst_37 = arith.constant 0.000000e+00 : f32
    %55 = vector.broadcast %cst_37 : f32 to vector<64x128xf32>
    %56 = arith.maximumf %54, %55 : vector<64x128xf32>
    %c5 = arith.constant 5 : index
    %c0_38 = arith.constant 0 : index
    %c0_39 = arith.constant 0 : index
    %57 = vector.load %arg3[%c5, %c0_38, %c0_39] : memref<6x64x64xbf16, #tpu.memory_space<vmem>>, vector<1x32x64xbf16>
    %58 = vector.shape_cast %57 : vector<1x32x64xbf16> to vector<32x64xbf16>
    %c5_40 = arith.constant 5 : index
    %c0_41 = arith.constant 0 : index
    %c0_42 = arith.constant 0 : index
    %59 = vector.load %arg4[%c5_40, %c0_41, %c0_42] : memref<6x64x1xf32, #tpu.memory_space<vmem>>, vector<1x32x1xf32>
    %60 = vector.shape_cast %59 : vector<1x32x1xf32> to vector<32x1xf32>
    %61 = arith.truncf %56 : vector<64x128xf32> to vector<64x128xbf16>
    %cst_43 = arith.constant dense<0.000000e+00> : vector<32x128xf32>
    %62 = tpu.matmul %58, %61, %cst_43 {dimension_numbers = #tpu.dot_dimension_numbers<[1], [0], [0], [1], [0, 0, 1, 1], [], []>} : vector<32x64xbf16>, vector<64x128xbf16>, vector<32x128xf32> -> vector<32x128xf32>
    %63 = vector.broadcast %60 : vector<32x1xf32> to vector<32x128xf32>
    %64 = arith.addf %62, %63 : vector<32x128xf32>
    %65 = arith.negf %64 : vector<32x128xf32>
    %66 = math.exp %65 : vector<32x128xf32>
    %cst_44 = arith.constant 1.000000e+00 : f32
    %67 = vector.broadcast %cst_44 : f32 to vector<32x128xf32>
    %68 = arith.addf %67, %66 : vector<32x128xf32>
    %69 = arith.divf %67, %68 : vector<32x128xf32>
    %c0_45 = arith.constant 0 : index
    %c0_46 = arith.constant 0 : index
    %70 = vector.load %arg5[%c0_45, %c0_46] : memref<32x128xf32, #tpu.memory_space<vmem>>, vector<32x128xf32>
    tpu.vector_store %arg5[%c0_45, %c0_46], %69 {strides = array<i32>} : memref<32x128xf32, #tpu.memory_space<vmem>>, vector<32x128xf32>,
    %c0_47 = arith.constant 0 : index
    %c0_48 = arith.constant 0 : index
    %71 = vector.load %arg6[%c0_47, %c0_48] : memref<16x128xf32, #tpu.memory_space<vmem>>, vector<16x128xf32>
    tpu.vector_store %arg6[%c0_47, %c0_48], %29 {strides = array<i32>} : memref<16x128xf32, #tpu.memory_space<vmem>>, vector<16x128xf32>,
    %c0_49 = arith.constant 0 : index
    %c0_50 = arith.constant 0 : index
    %72 = vector.load %arg7[%c0_49, %c0_50] : memref<16x128xf32, #tpu.memory_space<vmem>>, vector<16x128xf32>
    tpu.vector_store %arg7[%c0_49, %c0_50], %30 {strides = array<i32>} : memref<16x128xf32, #tpu.memory_space<vmem>>, vector<16x128xf32>,
    return
  }
  func.func @transform_0(%arg0: i32) -> (i32, i32) {
    %c0_i32 = arith.constant 0 : i32
    %c0_i32_0 = arith.constant 0 : i32
    return %c0_i32, %arg0 : i32, i32
  }
  func.func @transform_1(%arg0: i32) -> (i32, i32) {
    %c0_i32 = arith.constant 0 : i32
    %c0_i32_0 = arith.constant 0 : i32
    return %c0_i32, %arg0 : i32, i32
  }
  func.func @transform_2(%arg0: i32) -> (i32, i32, i32) {
    %c0_i32 = arith.constant 0 : i32
    %c0_i32_0 = arith.constant 0 : i32
    %c0_i32_1 = arith.constant 0 : i32
    %c0_i32_2 = arith.constant 0 : i32
    return %c0_i32, %c0_i32_0, %c0_i32_1 : i32, i32, i32
  }
  func.func @transform_3(%arg0: i32) -> (i32, i32, i32) {
    %c0_i32 = arith.constant 0 : i32
    %c0_i32_0 = arith.constant 0 : i32
    %c0_i32_1 = arith.constant 0 : i32
    %c0_i32_2 = arith.constant 0 : i32
    return %c0_i32, %c0_i32_0, %c0_i32_1 : i32, i32, i32
  }
  func.func @transform_4(%arg0: i32) -> (i32, i32) {
    %c0_i32 = arith.constant 0 : i32
    %c0_i32_0 = arith.constant 0 : i32
    return %c0_i32, %arg0 : i32, i32
  }
  func.func @transform_5(%arg0: i32) -> (i32, i32) {
    %c0_i32 = arith.constant 0 : i32
    %c0_i32_0 = arith.constant 0 : i32
    return %c0_i32, %arg0 : i32, i32
  }
  func.func @transform_6(%arg0: i32) -> (i32, i32) {
    %c0_i32 = arith.constant 0 : i32
    %c0_i32_0 = arith.constant 0 : i32
    return %c0_i32, %arg0 : i32, i32
  }
}

</mosaic_0001>

<bundles_post_ra>
// kernel: vae_forward.1
= control target key start
LH: loop header
LB: loop body
LE: loop exit
PB: predicated region body
PF: predicated region fallthrough
CT: control target
= control target key end

     0   :  { %v1027_v3 = vmov 0   ;;  %vm103_vm0 = vcmask 261120   ;;  %vm233_vm1 = vcmask 523264   ;;  %vm443_vm2 = vcmask 130048   ;;  %s1265_s0 = inlined_call_operand.vmem [shape: f32[32,128], index: 0, kind: input, shape index: {}]   ;;  %s1266_s2 = inlined_call_operand.vmem [shape: bf16[6,64,64], index: 2, kind: input, shape index: {}]   ;;  %s1267_s3 = inlined_call_operand.vmem [shape: f32[6,64,1], index: 3, kind: input, shape index: {}]   ;;  %s1268_s6 = inlined_call_operand.vmem [shape: f32[16,128], index: 6, kind: output, shape index: {2}]   ;;  %s1269_s5 = inlined_call_operand.vmem [shape: f32[16,128], index: 5, kind: output, shape index: {1}]   ;;  %s1270_s1 = inlined_call_operand.vmem [shape: f32[16,128], index: 1, kind: input, shape index: {}]   ;;  %s1271_s4 = inlined_call_operand.vmem [shape: f32[32,128], index: 4, kind: output, shape index: {0}]  }
   0x1   :  { %v23_v0 = vld [vmem:[%s1265_s0 + $0x10] sm:$0xff]  ;;  %v24_v1 = vld [vmem:[%s1265_s0 + $0x18] sm:$0xff]  ;;  %v21_v2 = vld [vmem:[%s1265_s0] sm:$0xff]  ;;  %989 = vset.pattern.permute.xlu0 %v1027_v3  ;;  %990 = vset.pattern.permute.xlu1 %v1027_v3 }
   0x2   :  { %v42_v4 = vpack.c.bf16 %v24_v1, %v23_v0  ;;  %v22_v5 = vld [vmem:[%s1265_s0 + $0x8] sm:$0xff]  ;;  %v991_v7 = vld [vmem:[%s1266_s2] sm:$0xff]   ;;  %v39_v8 = vld [vmem:[%s1267_s3 + $0x30] sm:$0xff] }
   0x3   :  { %v41_v6 = vpack.c.bf16 %v22_v5, %v21_v2  ;;  %930 = vmatprep.mubr.msk.bf16.mxu0 %vm103_vm0, %v991_v7  ;;  %75 = vperm.xlu0 %989, %v39_v8   ;;  %v37_v9 = vld [vmem:[%s1267_s3 + $0x20] sm:$0xff]  ;;  %v992_v10 = vld [vmem:[%s1266_s2 + $0x8] sm:$0xff]   ;;  %v40_v11 = vld [vmem:[%s1267_s3 + $0x38] sm:$0xff] }
   0x4   :  { %926 = vmatprep.subr.bf16.mxu0 %v42_v4  ;;  %65 = vperm.xlu1 %990, %v37_v9   ;;  %v993_v12 = vld [vmem:[%s1266_s2 + $0x10] sm:$0xff]   ;;  %v38_v13 = vld [vmem:[%s1267_s3 + $0x28] sm:$0xff]  ;;  %v36_v15 = vld [vmem:[%s1267_s3 + $0x18] sm:$0xff] }
   0x5   :  { %927 = vmatpush3.bf16.msra.mxu0 %v42_v4  ;;  %v35_v14 = vld [vmem:[%s1267_s3 + $0x10] sm:$0xff]  ;;  %v994_v16 = vld [vmem:[%s1266_s2 + $0x18] sm:$0xff]   ;;  %v33_v17 = vld [vmem:[%s1267_s3] sm:$0xff] }
   0x6   :  { %928 = vmatprep.subr.bf16.mxu0 %v41_v6  ;;  %v34_v18 = vld [vmem:[%s1267_s3 + $0x8] sm:$0xff]  ;;  %v825_v19 = vld [vmem:[%s1267_s3 + $0x50] sm:$0xff]  ;;  %v826_v20 = vld [vmem:[%s1267_s3 + $0x58] sm:$0xff] }
   0x7   :  { %80 = vperm.xlu0 %989, %v40_v11   ;;  %v823_v21 = vld [vmem:[%s1267_s3 + $0x40] sm:$0xff]  ;;  %v824_v22 = vld [vmem:[%s1267_s3 + $0x48] sm:$0xff]  ;;  %v837_v23 = vld [vmem:[%s1267_s3 + $0x90] sm:$0xff] }
   0x8   :  { %70 = vperm.xlu1 %990, %v38_v13   ;;  %v838_v24 = vld [vmem:[%s1267_s3 + $0x98] sm:$0xff]  ;;  %v835_v25 = vld [vmem:[%s1267_s3 + $0x80] sm:$0xff]  ;;  %v836_v26 = vld [vmem:[%s1267_s3 + $0x88] sm:$0xff] }
   0x9   :  { %929 = vmatpush3.bf16.msra.mxu0 %v41_v6  ;;  %v849_v27 = vld [vmem:[%s1267_s3 + $0xd0] sm:$0xff]  ;;  %v850_v28 = vld [vmem:[%s1267_s3 + $0xd8] sm:$0xff]  ;;  %v847_v29 = vld [vmem:[%s1267_s3 + $0xc0] sm:$0xff] }
   0xa   :  { %v848_v30 = vld [vmem:[%s1267_s3 + $0xc8] sm:$0xff]  ;;  %v869_v31 = vld [vmem:[%s1267_s3 + $0x130] sm:$0xff]  ;;  %v870_v32 = vld [vmem:[%s1267_s3 + $0x138] sm:$0xff] }
   0xb   :  { %55 = vperm.xlu0 %989, %v35_v14   ;;  %v867_v33 = vld [vmem:[%s1267_s3 + $0x120] sm:$0xff]  ;;  %v868_v34 = vld [vmem:[%s1267_s3 + $0x128] sm:$0xff]  ;;  %v865_v35 = vld [vmem:[%s1267_s3 + $0x110] sm:$0xff] }
   0xc   :  { %931 = vmatmul.mubr.msk.bf16.vlgmr.msra.gmra.mxu0 %vm103_vm0, %v992_v10  ;;  %60 = vperm.xlu1 %990, %v36_v15   ;;  %v866_v36 = vld [vmem:[%s1267_s3 + $0x118] sm:$0xff]  ;;  %v863_v37 = vld [vmem:[%s1267_s3 + $0x100] sm:$0xff]  ;;  %v864_v38 = vld [vmem:[%s1267_s3 + $0x108] sm:$0xff] }
   0xd   :  { %934 = vmatprep.mubr.msk.bf16.mxu0 %vm103_vm0, %v993_v12  ;;  %v883_v39 = vld [vmem:[%s1267_s3 + $0x140] sm:$0xff]  ;;  %v884_v40 = vld [vmem:[%s1267_s3 + $0x148] sm:$0xff]  ;;  %v885_v41 = vld [vmem:[%s1267_s3 + $0x150] sm:$0xff] }
   0xe   :  { %v886_v42 = vld [vmem:[%s1267_s3 + $0x158] sm:$0xff]  ;;  %v995_v43 = vld [vmem:[%s1266_s2 + $0x20] sm:$0xff]  }
   0xf   :  { %45 = vperm.xlu0 %989, %v33_v17   ;;  %946 = vmatprep.mubr.msk.bf16.mxu1 %vm233_vm1, %v995_v43  ;;  %v997_v17 = vld [vmem:[%s1266_s2 + $0x40] sm:$0xff]  }
  0x10   :  { %50 = vperm.xlu1 %990, %v34_v18  }
  0x13   :  { %215 = vperm.xlu0 %989, %v825_v19  }
  0x14   :  { %935 = vmatmul.mubr.msk.bf16.gmra.mxu0 %vm103_vm0, %v994_v16  ;;  %220 = vperm.xlu1 %990, %v826_v20   ;;  %v996_v16 = vld [vmem:[%s1266_s2 + $0x28] sm:$0xff]  }
  0x15   :  { %954 = vmatprep.mubr.msk.bf16.mxu0 %vm103_vm0, %v997_v17 }
  0x17   :  { %205 = vperm.xlu0 %989, %v823_v21  }
  0x18   :  { %210 = vperm.xlu1 %990, %v824_v22  }
  0x1b   :  { %317 = vperm.xlu0 %989, %v837_v23  }
  0x1c   :  { %322 = vperm.xlu1 %990, %v838_v24  }
  0x1f   :  { %307 = vperm.xlu0 %989, %v835_v25  }
  0x20   :  { %312 = vperm.xlu1 %990, %v836_v26  }
  0x23   :  { %425 = vperm.xlu0 %989, %v849_v27  }
  0x24   :  { %430 = vperm.xlu1 %990, %v850_v28  }
  0x27   :  { %415 = vperm.xlu0 %989, %v847_v29  }
  0x28   :  { %420 = vperm.xlu1 %990, %v848_v30  }
  0x2b   :  { %555 = vperm.xlu0 %989, %v869_v31  }
  0x2c   :  { %560 = vperm.xlu1 %990, %v870_v32  }
  0x2f   :  { %545 = vperm.xlu0 %989, %v867_v33  }
  0x30   :  { %550 = vperm.xlu1 %990, %v868_v34  }
  0x33   :  { %535 = vperm.xlu0 %989, %v865_v35  }
  0x34   :  { %540 = vperm.xlu1 %990, %v866_v36   ;;  %v998_v36 = vld [vmem:[%s1266_s2 + $0x48] sm:$0xff]  }
  0x37   :  { %525 = vperm.xlu0 %989, %v863_v37   ;;  %v999_v37 = vld [vmem:[%s1266_s2 + $0x60] sm:$0xff]  }
  0x38   :  { %530 = vperm.xlu1 %990, %v864_v38  }
  0x3b   :  { %684 = vperm.xlu0 %989, %v883_v39  }
  0x3c   :  { %689 = vperm.xlu1 %990, %v884_v40  }
  0x3f   :  { %694 = vperm.xlu0 %989, %v885_v41  }
  0x40   :  { %699 = vperm.xlu1 %990, %v886_v42  }
  0x7e   :  { %v76_v46 = vpop.permute.xlu0 %75 }
  0x7f   :  { %v66_v44 = vpop.permute.xlu1 %65 }
  0x82   :  { %v81_v51 = vpop.permute.xlu0 %80 }
  0x83   :  { %v71_v49 = vpop.permute.xlu1 %70 }
  0x86   :  { %v56_v59 = vpop.permute.xlu0 %55 }
  0x87   :  { %v61_v55 = vpop.permute.xlu1 %60 }
  0x8a   :  { %v46_v9 = vpop.permute.xlu0 %45 }
  0x8b   :  { %v51_v5 = vpop.permute.xlu1 %50 }
  0x8e   :  { %v216_v18 = vpop.permute.xlu0 %215 }
  0x8f   :  { %v221_v19 = vpop.permute.xlu1 %220 }
  0x92   :  { %v206_v23 = vpop.permute.xlu0 %205 }
  0x93   :  { %v211_v27 = vpop.permute.xlu1 %210 }
  0x96   :  { %v318_v38 = vpop.permute.xlu0 %317 }
  0x97   :  { %v323_v39 = vpop.permute.xlu1 %322 }
  0x9a   :  { %v308_v42 = vpop.permute.xlu0 %307 }
  0xcc   :  { %v932_v45 = vpop.f32.mrf.mxu0 }
  0xcd   :  { %v159_v1 = vadd.f32 %v932_v45, %v56_v59 }
  0xce   :  { %v150_v47 = vpop.f32.mrf.mxu0 }
  0xcf   :  { %v183_v10 = vmax.f32 %v159_v1, 0.0  ;;  %v151_v11 = vadd.f32 %v150_v47, %v46_v9  ;;  %v426_v1 = vpop.permute.xlu0 %425 }
  0xd0   :  { %v933_v48 = vpop.f32.mrf.mxu0 }
  0xd1   :  { %v162_v61 = vadd.f32 %v933_v48, %v61_v55  ;;  %v181_v14 = vmax.f32 %v151_v11, 0.0  ;;  %v390_v55 = vld [vmem:[%s1270_s1] sm:$0xff] }
  0xd2   :  { %v153_v50 = vpop.f32.mrf.mxu0 }
  0xd3   :  { %v184_v6 = vmax.f32 %v162_v61, 0.0  ;;  %v154_v7 = vadd.f32 %v153_v50, %v51_v5 }
  0xd4   :  { %v936_v52 = vpop.f32.mrf.mxu0 }
  0xd5   :  { %v175_v54 = vadd.f32 %v936_v52, %v76_v46  ;;  %v200_v12 = vpack.c.bf16 %v184_v6, %v183_v10  ;;  %v182_v13 = vmax.f32 %v154_v7, 0.0  ;;  %v416_v6 = vpop.permute.xlu0 %415 }
  0xd6   :  { %v166_v53 = vpop.f32.mrf.mxu0 }
  0xd7   :  { %v167_v57 = vadd.f32 %v166_v53, %v66_v44  ;;  %v187_v62 = vmax.f32 %v175_v54, 0.0  ;;  %v199_v15 = vpack.c.bf16 %v182_v13, %v181_v14 }
  0xd8   :  { %v937_v56 = vpop.f32.mrf.mxu0 }
  0xd9   :  { %v178_v58 = vadd.f32 %v937_v56, %v81_v51  ;;  %v185_v2 = vmax.f32 %v167_v57, 0.0  ;;  %v391_v56 = vld [vmem:[%s1270_s1 + $0x8] sm:$0xff] }
  0xda   :  { %v169_v60 = vpop.f32.mrf.mxu0 }
  0xdb   :  { %v188_v63 = vmax.f32 %v178_v58, 0.0  ;;  %v170_v0 = vadd.f32 %v169_v60, %v71_v49  ;;  %v313_v49 = vpop.permute.xlu1 %312 }
  0xdd   :  { %v186_v3 = vmax.f32 %v170_v0, 0.0  ;;  %v202_v4 = vpack.c.bf16 %v188_v63, %v187_v62  ;;  %v1000_v63 = vld [vmem:[%s1266_s2 + $0x68] sm:$0xff]   ;;  %v1001_v0 = vld [vmem:[%s1266_s2 + $0x80] sm:$0xff]  }
  0xdf   :  { %v201_v8 = vpack.c.bf16 %v186_v3, %v185_v2  ;;  %938 = vmatprep.subr.bf16.mxu1 %v202_v4  ;;  %v431_v2 = vpop.permute.xlu1 %430 }
  0xe0   :  { %939 = vmatpush3.bf16.msra.mxu1 %v202_v4 }
  0xe1   :  { %940 = vmatprep.subr.bf16.mxu1 %v201_v8 }
  0xe3   :  { %v421_v10 = vpop.permute.xlu1 %420 }
  0xe4   :  { %941 = vmatpush3.bf16.msra.mxu1 %v201_v8 }
  0xe5   :  { %942 = vmatprep.subr.bf16.mxu1 %v200_v12 }
  0xe8   :  { %943 = vmatpush3.bf16.msra.mxu1 %v200_v12 }
  0xe9   :  { %944 = vmatprep.subr.bf16.mxu1 %v199_v15 }
  0xec   :  { %945 = vmatpush3.bf16.msra.mxu1 %v199_v15 }
  0xef   :  { %947 = vmatmul.mubr.msk.bf16.vlgmr.msra.gmra.mxu1 %vm233_vm1, %v996_v16 }
  0xf0   :  { %960 = vmatprep.mubr.msk.bf16.mxu1 %vm443_vm2, %v999_v37 }
 0x1af   :  { %v948_v20 = vpop.f32.mrf.mxu1 }
 0x1b0   :  { %v283_v22 = vadd.f32 %v948_v20, %v216_v18  ;;  %v1003_v20 = vld [vmem:[%s1266_s2 + $0x90] sm:$0xff]  }
 0x1b1   :  { %v274_v21 = vpop.f32.mrf.mxu1 }
 0x1b2   :  { %v275_v25 = vadd.f32 %v274_v21, %v206_v23  ;;  %v291_v29 = vmax.f32 %v283_v22, 0.0  ;;  %v1004_v21 = vld [vmem:[%s1266_s2 + $0x98] sm:$0xff]   ;;  %v1005_v22 = vld [vmem:[%s1266_s2 + $0xa0] sm:$0xff]   ;;  %v561_v23 = vpop.permute.xlu1 %560 }
 0x1b3   :  { %v949_v24 = vpop.f32.mrf.mxu1 }
 0x1b4   :  { %v286_v26 = vadd.f32 %v949_v24, %v221_v19  ;;  %v289_v32 = vmax.f32 %v275_v25, 0.0  ;;  %v1002_v19 = vld [vmem:[%s1266_s2 + $0x88] sm:$0xff]   ;;  %v556_v25 = vpop.permute.xlu0 %555 }
 0x1b5   :  { %v277_v28 = vpop.f32.mrf.mxu1 }
 0x1b6   :  { %v292_v30 = vmax.f32 %v286_v26, 0.0  ;;  %v278_v31 = vadd.f32 %v277_v28, %v211_v27  ;;  %v551_v28 = vpop.permute.xlu1 %550 }
 0x1b8   :  { %v304_v33 = vpack.c.bf16 %v292_v30, %v291_v29  ;;  %v290_v34 = vmax.f32 %v278_v31, 0.0  ;;  %v546_v30 = vpop.permute.xlu0 %545 }
 0x1ba   :  { %v303_v35 = vpack.c.bf16 %v290_v34, %v289_v32  ;;  %950 = vmatprep.subr.bf16.mxu0 %v304_v33  ;;  %v541_v34 = vpop.permute.xlu1 %540 }
 0x1bb   :  { %951 = vmatpush3.bf16.msra.mxu0 %v304_v33 }
 0x1bc   :  { %952 = vmatprep.subr.bf16.mxu0 %v303_v35 }
 0x1bf   :  { %953 = vmatpush3.bf16.msra.mxu0 %v303_v35 }
 0x1c2   :  { %955 = vmatmul.mubr.msk.bf16.vlgmr.msra.gmra.mxu0 %vm103_vm0, %v998_v36 }
 0x1c3   :  { %968 = vmatprep.mubr.msk.bf16.mxu0 %vm103_vm0, %v1001_v0 }
 0x282   :  { %v956_v40 = vpop.f32.mrf.mxu0 }
 0x283   :  { %v384_v41 = vadd.f32 %v956_v40, %v318_v38  ;;  %v536_v38 = vpop.permute.xlu0 %535 }
 0x284   :  { %v375_v43 = vpop.f32.mrf.mxu0 }
 0x285   :  { %v392_v44 = vmul.f32 0.5, %v384_v41  ;;  %797 = vst [vmem:[%s1268_s6] sm:$0xff] %v384_v41  ;;  %v376_v45 = vadd.f32 %v375_v43, %v308_v42 }
 0x286   :  { %v957_v46 = vpop.f32.mrf.mxu0 }
 0x287   :  { %v394_v47 = vmul.f32 1.442695, %v392_v44  ;;  %795 = vst [vmem:[%s1269_s5] sm:$0xff] %v376_v45  ;;  %v387_v48 = vadd.f32 %v957_v46, %v323_v39 }
 0x288   :  { %v378_v50 = vpop.f32.mrf.mxu0 }
 0x289   :  { %1007 = vpow2.f32 %v394_v47  ;;  %v393_v51 = vmul.f32 0.5, %v387_v48  ;;  %798 = vst [vmem:[%s1268_s6 + $0x8] sm:$0xff] %v387_v48  ;;  %v379_v52 = vadd.f32 %v378_v50, %v313_v49  ;;  %v531_v48 = vpop.permute.xlu1 %530 }
 0x28b   :  { %v396_v53 = vmul.f32 1.442695, %v393_v51  ;;  %796 = vst [vmem:[%s1269_s5 + $0x8] sm:$0xff] %v379_v52 }
 0x28d   :  { %1009 = vpow2.f32 %v396_v53 }
 0x296   :  { %v1008_v54 = vpop.eup %1007 }
 0x297   :  { %v398_v57 = vmul.f32 %v1008_v54, %v390_v55 }
 0x299   :  { %v400_v60 = vadd.f32 %v398_v57, %v376_v45 }
 0x29a   :  { %v1010_v58 = vpop.eup %1009 }
 0x29b   :  { %v399_v59 = vmul.f32 %v1010_v58, %v391_v56 }
 0x29d   :  { %v401_v61 = vadd.f32 %v399_v59, %v379_v52  ;;  %v526_v52 = vpop.permute.xlu0 %525  ;;  %v1006_v59 = vld [vmem:[%s1266_s2 + $0xa8] sm:$0xff]  }
 0x29f   :  { %v412_v62 = vpack.c.bf16 %v401_v61, %v400_v60  ;;  %v690_v61 = vpop.permute.xlu1 %689 }
 0x2a1   :  { %958 = vmatprep.subr.bf16.mxu1 %v412_v62  ;;  %v685_v60 = vpop.permute.xlu0 %684 }
 0x2a2   :  { %959 = vmatpush3.bf16.msra.mxu1 %v412_v62 }
 0x2a5   :  { %961 = vmatmul.mubr.msk.bf16.vlgmr.msra.gmra.mxu1 %vm443_vm2, %v1000_v63  ;;  %v695_v62 = vpop.permute.xlu0 %694 }
 0x2a6   :  { %984 = vmatprep.mubr.msk.bf16.mxu1 %vm233_vm1, %v1005_v22 }
 0x365   :  { %v962_v3 = vpop.f32.mrf.mxu1 }
 0x366   :  { %v493_v5 = vadd.f32 %v962_v3, %v426_v1 }
 0x367   :  { %v484_v4 = vpop.f32.mrf.mxu1 }
 0x368   :  { %v485_v8 = vadd.f32 %v484_v4, %v416_v6  ;;  %v501_v12 = vmax.f32 %v493_v5, 0.0  ;;  %v700_v4 = vpop.permute.xlu1 %699 }
 0x369   :  { %v963_v7 = vpop.f32.mrf.mxu1 }
 0x36a   :  { %v496_v9 = vadd.f32 %v963_v7, %v431_v2  ;;  %v499_v15 = vmax.f32 %v485_v8, 0.0 }
 0x36b   :  { %v487_v11 = vpop.f32.mrf.mxu1 }
 0x36c   :  { %v502_v13 = vmax.f32 %v496_v9, 0.0  ;;  %v488_v14 = vadd.f32 %v487_v11, %v421_v10 }
 0x36e   :  { %v522_v16 = vpack.c.bf16 %v502_v13, %v501_v12  ;;  %v500_v17 = vmax.f32 %v488_v14, 0.0 }
 0x370   :  { %v521_v18 = vpack.c.bf16 %v500_v17, %v499_v15  ;;  %964 = vmatprep.subr.bf16.mxu0 %v522_v16 }
 0x371   :  { %965 = vmatpush3.bf16.msra.mxu0 %v522_v16 }
 0x372   :  { %966 = vmatprep.subr.bf16.mxu0 %v521_v18 }
 0x375   :  { %967 = vmatpush3.bf16.msra.mxu0 %v521_v18 }
 0x378   :  { %969 = vmatmul.mubr.msk.bf16.vlgmr.msra.gmra.mxu0 %vm103_vm0, %v1002_v19 }
 0x379   :  { %972 = vmatprep.mubr.msk.bf16.mxu0 %vm103_vm0, %v1003_v20 }
 0x380   :  { %973 = vmatmul.mubr.msk.bf16.gmra.mxu0 %vm103_vm0, %v1004_v21 }
 0x438   :  { %v970_v24 = vpop.f32.mrf.mxu0 }
 0x439   :  { %v638_v44 = vadd.f32 %v970_v24, %v536_v38 }
 0x43a   :  { %v629_v26 = vpop.f32.mrf.mxu0 }
 0x43b   :  { %v662_v53 = vmax.f32 %v638_v44, 0.0  ;;  %v630_v54 = vadd.f32 %v629_v26, %v526_v52 }
 0x43c   :  { %v971_v27 = vpop.f32.mrf.mxu0 }
 0x43d   :  { %v641_v40 = vadd.f32 %v971_v27, %v541_v34  ;;  %v660_v57 = vmax.f32 %v630_v54, 0.0 }
 0x43e   :  { %v632_v29 = vpop.f32.mrf.mxu0 }
 0x43f   :  { %v663_v49 = vmax.f32 %v641_v40, 0.0  ;;  %v633_v50 = vadd.f32 %v632_v29, %v531_v48 }
 0x440   :  { %v974_v31 = vpop.f32.mrf.mxu0 }
 0x441   :  { %v654_v33 = vadd.f32 %v974_v31, %v556_v25  ;;  %v679_v55 = vpack.c.bf16 %v663_v49, %v662_v53  ;;  %v661_v56 = vmax.f32 %v633_v50, 0.0 }
 0x442   :  { %v645_v32 = vpop.f32.mrf.mxu0 }
 0x443   :  { %v646_v36 = vadd.f32 %v645_v32, %v546_v30  ;;  %v666_v41 = vmax.f32 %v654_v33, 0.0  ;;  %v678_v58 = vpack.c.bf16 %v661_v56, %v660_v57 }
 0x444   :  { %v975_v35 = vpop.f32.mrf.mxu0 }
 0x445   :  { %v657_v37 = vadd.f32 %v975_v35, %v561_v23  ;;  %v664_v45 = vmax.f32 %v646_v36, 0.0 }
 0x446   :  { %v648_v39 = vpop.f32.mrf.mxu0 }
 0x447   :  { %v667_v42 = vmax.f32 %v657_v37, 0.0  ;;  %v649_v43 = vadd.f32 %v648_v39, %v551_v28 }
 0x449   :  { %v681_v46 = vpack.c.bf16 %v667_v42, %v666_v41  ;;  %v665_v47 = vmax.f32 %v649_v43, 0.0 }
 0x44b   :  { %v680_v51 = vpack.c.bf16 %v665_v47, %v664_v45  ;;  %976 = vmatprep.subr.bf16.mxu1 %v681_v46 }
 0x44c   :  { %977 = vmatpush3.bf16.msra.mxu1 %v681_v46 }
 0x44d   :  { %978 = vmatprep.subr.bf16.mxu1 %v680_v51 }
 0x450   :  { %979 = vmatpush3.bf16.msra.mxu1 %v680_v51 }
 0x451   :  { %980 = vmatprep.subr.bf16.mxu1 %v679_v55 }
 0x454   :  { %981 = vmatpush3.bf16.msra.mxu1 %v679_v55 }
 0x455   :  { %982 = vmatprep.subr.bf16.mxu1 %v678_v58 }
 0x458   :  { %983 = vmatpush3.bf16.msra.mxu1 %v678_v58 }
 0x45b   :  { %985 = vmatmul.mubr.msk.bf16.vlgmr.msra.gmra.mxu1 %vm233_vm1, %v1006_v59 }
 0x51b   :  { %v986_v63 = vpop.f32.mrf.mxu1 }
 0x51c   :  { %v761_v0 = vadd.f32 %v986_v63, %v695_v62 }
 0x51d   :  { %v752_v1 = vpop.f32.mrf.mxu1 }
 0x51e   :  { %v893_v2 = vmul.f32 -1.442695, %v761_v0  ;;  %v753_v3 = vadd.f32 %v752_v1, %v685_v60 }
 0x51f   :  { %v987_v5 = vpop.f32.mrf.mxu1 }
 0x520   :  { %1011 = vpow2.f32 %v893_v2  ;;  %v891_v6 = vmul.f32 -1.442695, %v753_v3  ;;  %v764_v7 = vadd.f32 %v987_v5, %v700_v4 }
 0x521   :  { %v755_v8 = vpop.f32.mrf.mxu1 }
 0x522   :  { %1013 = vpow2.f32 %v891_v6  ;;  %v894_v9 = vmul.f32 -1.442695, %v764_v7  ;;  %v756_v10 = vadd.f32 %v755_v8, %v690_v61 }
 0x524   :  { %1015 = vpow2.f32 %v894_v9  ;;  %v892_v11 = vmul.f32 -1.442695, %v756_v10 }
 0x526   :  { %1017 = vpow2.f32 %v892_v11 }
 0x52d   :  { %v1012_v12 = vpop.eup %1011 }
 0x52e   :  { %v781_v13 = vadd.f32 1.0, %v1012_v12 }
 0x52f   :  { %v1014_v14 = vpop.eup %1013 }
 0x530   :  { %1019 = vrcp.f32 %v781_v13  ;;  %v779_v15 = vadd.f32 1.0, %v1014_v14 }
 0x531   :  { %v1016_v16 = vpop.eup %1015 }
 0x532   :  { %1021 = vrcp.f32 %v779_v15  ;;  %v782_v17 = vadd.f32 1.0, %v1016_v16 }
 0x533   :  { %v1018_v18 = vpop.eup %1017 }
 0x534   :  { %1023 = vrcp.f32 %v782_v17  ;;  %v780_v19 = vadd.f32 1.0, %v1018_v18 }
 0x536   :  { %1025 = vrcp.f32 %v780_v19 }
 0x53d   :  { %v1020_v20 = vpop.eup %1019 }
 0x53e   :  { %793 = vst [vmem:[%s1271_s4 + $0x10] sm:$0xff] %v1020_v20 }
 0x53f   :  { %v1022_v21 = vpop.eup %1021 }
 0x540   :  { %791 = vst [vmem:[%s1271_s4] sm:$0xff] %v1022_v21 }
 0x541   :  { %v1024_v22 = vpop.eup %1023 }
 0x542   :  { %794 = vst [vmem:[%s1271_s4 + $0x18] sm:$0xff] %v1024_v22 }
 0x543   :  { %v1026_v23 = vpop.eup %1025 }
 0x544   :  { %792 = vst [vmem:[%s1271_s4 + $0x8] sm:$0xff] %v1026_v23 }

</bundles_post_ra>
